<compile_context>
chip_gen: v5e
topology: v5e:2x2
jax: 0.10.0
libtpu: 0.0.40
codegen_flags: <defaults>
</compile_context>

<pallas_src>
import jax
import jax.numpy as jnp
from jax import lax
from jax.experimental import pallas as pl
from jax.experimental.pallas import tpu as pltpu

NUM_INPUT = 32     # num_input == nfeat == RNN hidden size
HIDDEN = 250       # autoencoder hidden width (from the module definition)
HIDDEN_PAD = 256   # padded to a lane-aligned width (zero columns/rows)
BN_EPS = 1e-5


def _vmem():
    return pl.BlockSpec(memory_space=pltpu.MemorySpace.VMEM)


def _smem():
    return pl.BlockSpec(memory_space=pltpu.MemorySpace.SMEM)


# ---------------------------------------------------------------------------
# fused kernel: RNN over the sequence + autoencoder + autoregressive forecast
# ---------------------------------------------------------------------------
def fused_forward_kernel(gap_ref, maxgap_ref, x_ref,
                         wih_ref, whh_ref, wcat_ref, brnn_ref,
                         w1_ref, b1_ref, w2_ref, b2_ref, w3_ref, b3_ref,
                         y_ref, xpred_ref):
    # gap_ref:    (B, 1) int32   VMEM   per-sample prediction gap (>= 1)
    # maxgap_ref: (1,)   int32   SMEM   max(gap) -> dynamic forecast trip count
    # x_ref:      (T*B, F) f32   VMEM   time-major flattened input sequence
    # wih/whh:    (F, F)  bf16          RNN weights (stored transposed)
    # wcat:       (2F, F) bf16          [W_ih; W_hh] for the forecast recurrence
    # brnn:       (1, F)  f32           b_ih + b_hh
    # w1/w2/w3:   bf16 folded+padded autoencoder weights, b1/b2/b3 f32 biases
    # y_ref:      (T*B, F) f32 out      autoencoder(hidden), time-major slab
    # xpred_ref:  (B, F)   f32 out      forecast at each sample's gap
    TB, F = x_ref.shape
    B = gap_ref.shape[0]
    T = TB // B

    brnn = brnn_ref[...]                      # (1, F) f32 (tiny, keep resident)

    def autoenc(z):
        # Linear -> BN(folded) -> ReLU -> Linear -> BN(folded) -> ReLU
        # -> Linear -> BN(folded).  Dropout = identity (eval mode).
        # Weights are loaded from their VMEM refs at each matmul site so the
        # big bf16 w2 is never pinned across the serial phases.
        z = jnp.dot(z.astype(jnp.bfloat16), w1_ref[...],
                    preferred_element_type=jnp.float32) + b1_ref[...]
        z = jnp.maximum(z, 0.0)
        z = jnp.dot(z.astype(jnp.bfloat16), w2_ref[...],
                    preferred_element_type=jnp.float32) + b2_ref[...]
        z = jnp.maximum(z, 0.0)
        z = jnp.dot(z.astype(jnp.bfloat16), w3_ref[...],
                    preferred_element_type=jnp.float32) + b3_ref[...]
        return z

    # ---- phase 1: batched input projection (one MXU push for all T steps) --
    xw_all = (jnp.dot(x_ref[...].astype(jnp.bfloat16), wih_ref[...],
                      preferred_element_type=jnp.float32)
              + jnp.broadcast_to(brnn, (TB, F)))          # (T*B, F) f32

    # ---- phase 2: serial tanh recurrence (only h @ W_hh on the chain) ------
    whh = whh_ref[...]                                    # (F, F) bf16, ~2 KB
    h = jnp.zeros((B, F), jnp.float32)
    hs = []
    for t in range(T):
        h = jnp.tanh(xw_all[t * B:(t + 1) * B, :]
                     + jnp.dot(h.astype(jnp.bfloat16), whh,
                               preferred_element_type=jnp.float32))
        hs.append(h)
    h_all = jnp.concatenate(hs, axis=0)                   # (T*B, F) f32

    # ---- phase 3: autoencoder once over all hidden states, single store ----
    y_all = autoenc(h_all)                                # (T*B, F) f32
    y_ref[...] = y_all

    # ---- phase 4: autoregressive forecast, dynamic trip count, state kept
    #               in loop-carried vregs; in-loop select of x_pred ----------
    gap_m1 = gap_ref[...] - 1                             # (B, 1), hoisted
    n_steps = maxgap_ref[0]                               # SMEM scalar, no host sync
    wcat = wcat_ref[...]                                  # (2F, F) bf16, ~4 KB
    brnn_b = jnp.broadcast_to(brnn, (B, F))               # hoisted broadcast

    x_hat0 = y_all[(T - 1) * B:, :]                       # y[:, -1, :]
    h_hat0 = hs[-1]                                       # h[:, -1, :]
    xpred0 = jnp.zeros((B, F), jnp.float32)

    def body(g, carry):
        x_hat, h_hat, x_pred = carry
        xh = jnp.concatenate([x_hat, h_hat], axis=1).astype(jnp.bfloat16)
        h_new = jnp.tanh(
            jnp.dot(xh, wcat, preferred_element_type=jnp.float32) + brnn_b)
        x_new = autoenc(h_new)
        x_pred = jnp.where(gap_m1 == g, x_new, x_pred)
        return (x_new, h_new, x_pred)

    _, _, x_pred = lax.fori_loop(0, n_steps, body, (x_hat0, h_hat0, xpred0))
    xpred_ref[...] = x_pred


# ---------------------------------------------------------------------------
# loss: MSELoss(reduction='mean') * 1/nelement  ==  sum((a-b)^2) / nelt^2
# (matches the PyTorch reference `loss`)
# ---------------------------------------------------------------------------
def _mse_over_nelt(pred, target):
    nelt = pred.size
    return jnp.sum((pred - target) ** 2) / float(nelt * nelt)


# ---------------------------------------------------------------------------
# full forward (one fused pallas_call; only tiny glue in XLA)
# ---------------------------------------------------------------------------
def forward(x, t, params):
    B, Tp1, F = x.shape
    T = Tp1 - 1
    x_final = x[:, -1, :]
    x_seq = x[:, :T, :]

    # time-major flat sequence (T*B, F); tiny (~2 KB) XLA transpose
    x_tm = jnp.transpose(x_seq, (1, 0, 2)).reshape(T * B, F)
    # gap must be >= 1 (same assumption as the PyTorch reference)
    gap = jnp.maximum(jnp.reshape(t, (-1,)).astype(jnp.int32), 1)
    gap_col = gap.reshape(B, 1)
    max_gap = jnp.max(gap, keepdims=True)                 # (1,), stays on device

    y_slab, x_pred = pl.pallas_call(
        fused_forward_kernel,
        out_shape=(jax.ShapeDtypeStruct((T * B, F), jnp.float32),
                   jax.ShapeDtypeStruct((B, F), jnp.float32)),
        in_specs=[_vmem(),            # gap (B,1)
                  _smem(),            # max_gap (1,)
                  _vmem(),            # x (T*B,F)
                  _vmem(), _vmem(),   # wih, whh
                  _vmem(), _vmem(),   # wcat, brnn
                  _vmem(), _vmem(),   # w1, b1
                  _vmem(), _vmem(),   # w2, b2
                  _vmem(), _vmem()],  # w3, b3
        out_specs=(_vmem(), _vmem()),
    )(gap_col, max_gap, x_tm,
      params["wih"], params["whh"], params["wcat"], params["brnn"],
      params["w1"], params["b1"],
      params["w2"], params["b2"],
      params["w3"], params["b3"])

    y = jnp.transpose(y_slab.reshape(T, B, F), (1, 0, 2))  # (B, T, F)

    if T != 1:
        lossval = _mse_over_nelt(y[:, :-1, :], x_seq[:, 1:, :])
    else:
        lossval = jnp.float32(0.0)
    lossval = lossval + _mse_over_nelt(x_pred, x_final)
    return x_pred, lossval, y


# ---------------------------------------------------------------------------
# deterministic parameter init (module shapes) + BN folding + padding + bf16
# ---------------------------------------------------------------------------
def init_params(key, num_input=NUM_INPUT, hidden=HIDDEN, hidden_pad=HIDDEN_PAD):
    ks = jax.random.split(key, 22)

    def lin(kw, kb, fan_in, fan_out):
        bound = float(fan_in) ** -0.5
        w = jax.random.uniform(kw, (fan_in, fan_out), jnp.float32, -bound, bound)
        b = jax.random.uniform(kb, (1, fan_out), jnp.float32, -bound, bound)
        return w, b

    def bn(kg, kb, km, kv, dim):
        gamma = 1.0 + 0.1 * jax.random.normal(kg, (1, dim), jnp.float32)
        beta = 0.1 * jax.random.normal(kb, (1, dim), jnp.float32)
        mean = 0.1 * jax.random.normal(km, (1, dim), jnp.float32)
        var = jax.random.uniform(kv, (1, dim), jnp.float32, 0.5, 1.5)
        scale = gamma / jnp.sqrt(var + BN_EPS)
        shift = beta - mean * scale
        return scale, shift

    def fold(w, b, scale, shift):
        # (x @ w + b) * scale + shift == x @ (w*scale) + (b*scale + shift)
        return w * scale, b * scale + shift

    # RNN (weights stored transposed: (in, out)); bias = b_ih + b_hh
    bound = float(num_input) ** -0.5
    wih = jax.random.uniform(ks[0], (num_input, num_input), jnp.float32, -bound, bound)
    whh = jax.random.uniform(ks[1], (num_input, num_input), jnp.float32, -bound, bound)
    b_ih = jax.random.uniform(ks[2], (1, num_input), jnp.float32, -bound, bound)
    b_hh = jax.random.uniform(ks[3], (1, num_input), jnp.float32, -bound, bound)

    # autoencoder raw params
    w1, b1 = lin(ks[4], ks[5], num_input, hidden)
    s1, t1 = bn(ks[6], ks[7], ks[8], ks[9], hidden)
    w2, b2 = lin(ks[10], ks[11], hidden, hidden)
    s2, t2 = bn(ks[12], ks[13], ks[14], ks[15], hidden)
    w3, b3 = lin(ks[16], ks[17], hidden, num_input)
    s3, t3 = bn(ks[18], ks[19], ks[20], ks[21], num_input)

    # fold BN (inference running stats) into the linears
    w1f, b1f = fold(w1, b1, s1, t1)
    w2f, b2f = fold(w2, b2, s2, t2)
    w3f, b3f = fold(w3, b3, s3, t3)

    # zero-pad the 250-wide hidden dim to 256 (zeros are inert through ReLU)
    pad = hidden_pad - hidden
    w1f = jnp.pad(w1f, ((0, 0), (0, pad)))
    b1f = jnp.pad(b1f, ((0, 0), (0, pad)))
    w2f = jnp.pad(w2f, ((0, pad), (0, pad)))
    b2f = jnp.pad(b2f, ((0, 0), (0, pad)))
    w3f = jnp.pad(w3f, ((0, pad), (0, 0)))

    wih_bf = wih.astype(jnp.bfloat16)
    whh_bf = whh.astype(jnp.bfloat16)
    return {
        "wih": wih_bf,                                           # (F, F)  bf16
        "whh": whh_bf,                                           # (F, F)  bf16
        "wcat": jnp.concatenate([wih_bf, whh_bf], axis=0),       # (2F, F) bf16
        "brnn": b_ih + b_hh,                                     # (1, F)  f32
        "w1": w1f.astype(jnp.bfloat16), "b1": b1f,
        "w2": w2f.astype(jnp.bfloat16), "b2": b2f,
        "w3": w3f.astype(jnp.bfloat16), "b3": b3f,
    }


if __name__ == "__main__":
    key = jax.random.PRNGKey(0)
    kx, kt, kp = jax.random.split(key, 3)

    B, T, F = 2, 8, NUM_INPUT
    x = jax.random.normal(kx, (B, T + 1, F), jnp.float32)   # (batch, time, feature)
    t = jnp.array([2, 4], dtype=jnp.int32)                  # prediction gaps (>= 1)
    params = init_params(kp)

    fwd = jax.jit(forward)
    x_pred, lossval, y = fwd(x, t, params)
    jax.block_until_ready((x_pred, lossval, y))

    assert x_pred.shape == (B, F)
    assert y.shape == (B, T, F)
    assert lossval.shape == ()
    assert bool(jnp.all(jnp.isfinite(x_pred))) and bool(jnp.isfinite(lossval))
    print("KERNEL_OK")
</pallas_src>

<mosaic_0001>
module attributes {stable_mosaic.version = 11 : i64} {
  func.func @fused_forward_kernel(%arg0: memref<2x1xi32, #tpu.memory_space<vmem>>, %arg1: memref<1xi32, #tpu.memory_space<smem>>, %arg2: memref<16x32xf32, #tpu.memory_space<vmem>>, %arg3: memref<32x32xbf16, #tpu.memory_space<vmem>>, %arg4: memref<32x32xbf16, #tpu.memory_space<vmem>>, %arg5: memref<64x32xbf16, #tpu.memory_space<vmem>>, %arg6: memref<1x32xf32, #tpu.memory_space<vmem>>, %arg7: memref<32x256xbf16, #tpu.memory_space<vmem>>, %arg8: memref<1x256xf32, #tpu.memory_space<vmem>>, %arg9: memref<256x256xbf16, #tpu.memory_space<vmem>>, %arg10: memref<1x256xf32, #tpu.memory_space<vmem>>, %arg11: memref<256x32xbf16, #tpu.memory_space<vmem>>, %arg12: memref<1x32xf32, #tpu.memory_space<vmem>>, %arg13: memref<16x32xf32, #tpu.memory_space<vmem>>, %arg14: memref<2x32xf32, #tpu.memory_space<vmem>>) attributes {dimension_semantics = [], scalar_prefetch = 0 : i64, scratch_operands = 0 : i64, tpu.core_type = #tpu.core_type<tc>} {
    %c0 = arith.constant 0 : index
    %c0_0 = arith.constant 0 : index
    %0 = vector.load %arg6[%c0, %c0_0] : memref<1x32xf32, #tpu.memory_space<vmem>>, vector<1x32xf32>
    %c0_1 = arith.constant 0 : index
    %c0_2 = arith.constant 0 : index
    %1 = vector.load %arg2[%c0_1, %c0_2] : memref<16x32xf32, #tpu.memory_space<vmem>>, vector<16x32xf32>
    %2 = arith.truncf %1 : vector<16x32xf32> to vector<16x32xbf16>
    %c0_3 = arith.constant 0 : index
    %c0_4 = arith.constant 0 : index
    %3 = vector.load %arg3[%c0_3, %c0_4] : memref<32x32xbf16, #tpu.memory_space<vmem>>, vector<32x32xbf16>
    %cst = arith.constant dense<0.000000e+00> : vector<16x32xf32>
    %4 = tpu.matmul %2, %3, %cst {dimension_numbers = #tpu.dot_dimension_numbers<[1], [0], [0], [1], [0, 0, 1, 1], [], []>} : vector<16x32xbf16>, vector<32x32xbf16>, vector<16x32xf32> -> vector<16x32xf32>
    %5 = vector.shape_cast %0 : vector<1x32xf32> to vector<1x32xf32>
    %6 = vector.broadcast %5 : vector<1x32xf32> to vector<16x32xf32>
    %7 = arith.addf %4, %6 : vector<16x32xf32>
    %c0_5 = arith.constant 0 : index
    %c0_6 = arith.constant 0 : index
    %8 = vector.load %arg4[%c0_5, %c0_6] : memref<32x32xbf16, #tpu.memory_space<vmem>>, vector<32x32xbf16>
    %cst_7 = arith.constant 0.000000e+00 : f32
    %9 = vector.broadcast %cst_7 : f32 to vector<2x32xf32>
    %10 = vector.extract_strided_slice %7 {offsets = [0, 0], sizes = [2, 32], strides = [1, 1]} : vector<16x32xf32> to vector<2x32xf32>
    %11 = arith.truncf %9 : vector<2x32xf32> to vector<2x32xbf16>
    %cst_8 = arith.constant dense<0.000000e+00> : vector<2x32xf32>
    %12 = tpu.matmul %11, %8, %cst_8 {dimension_numbers = #tpu.dot_dimension_numbers<[1], [0], [0], [1], [0, 0, 1, 1], [], []>} : vector<2x32xbf16>, vector<32x32xbf16>, vector<2x32xf32> -> vector<2x32xf32>
    %13 = arith.addf %10, %12 : vector<2x32xf32>
    %14 = math.tanh %13 : vector<2x32xf32>
    %15 = vector.extract_strided_slice %7 {offsets = [2, 0], sizes = [2, 32], strides = [1, 1]} : vector<16x32xf32> to vector<2x32xf32>
    %16 = arith.truncf %14 : vector<2x32xf32> to vector<2x32xbf16>
    %cst_9 = arith.constant dense<0.000000e+00> : vector<2x32xf32>
    %17 = tpu.matmul %16, %8, %cst_9 {dimension_numbers = #tpu.dot_dimension_numbers<[1], [0], [0], [1], [0, 0, 1, 1], [], []>} : vector<2x32xbf16>, vector<32x32xbf16>, vector<2x32xf32> -> vector<2x32xf32>
    %18 = arith.addf %15, %17 : vector<2x32xf32>
    %19 = math.tanh %18 : vector<2x32xf32>
    %20 = vector.extract_strided_slice %7 {offsets = [4, 0], sizes = [2, 32], strides = [1, 1]} : vector<16x32xf32> to vector<2x32xf32>
    %21 = arith.truncf %19 : vector<2x32xf32> to vector<2x32xbf16>
    %cst_10 = arith.constant dense<0.000000e+00> : vector<2x32xf32>
    %22 = tpu.matmul %21, %8, %cst_10 {dimension_numbers = #tpu.dot_dimension_numbers<[1], [0], [0], [1], [0, 0, 1, 1], [], []>} : vector<2x32xbf16>, vector<32x32xbf16>, vector<2x32xf32> -> vector<2x32xf32>
    %23 = arith.addf %20, %22 : vector<2x32xf32>
    %24 = math.tanh %23 : vector<2x32xf32>
    %25 = vector.extract_strided_slice %7 {offsets = [6, 0], sizes = [2, 32], strides = [1, 1]} : vector<16x32xf32> to vector<2x32xf32>
    %26 = arith.truncf %24 : vector<2x32xf32> to vector<2x32xbf16>
    %cst_11 = arith.constant dense<0.000000e+00> : vector<2x32xf32>
    %27 = tpu.matmul %26, %8, %cst_11 {dimension_numbers = #tpu.dot_dimension_numbers<[1], [0], [0], [1], [0, 0, 1, 1], [], []>} : vector<2x32xbf16>, vector<32x32xbf16>, vector<2x32xf32> -> vector<2x32xf32>
    %28 = arith.addf %25, %27 : vector<2x32xf32>
    %29 = math.tanh %28 : vector<2x32xf32>
    %30 = vector.extract_strided_slice %7 {offsets = [8, 0], sizes = [2, 32], strides = [1, 1]} : vector<16x32xf32> to vector<2x32xf32>
    %31 = arith.truncf %29 : vector<2x32xf32> to vector<2x32xbf16>
    %cst_12 = arith.constant dense<0.000000e+00> : vector<2x32xf32>
    %32 = tpu.matmul %31, %8, %cst_12 {dimension_numbers = #tpu.dot_dimension_numbers<[1], [0], [0], [1], [0, 0, 1, 1], [], []>} : vector<2x32xbf16>, vector<32x32xbf16>, vector<2x32xf32> -> vector<2x32xf32>
    %33 = arith.addf %30, %32 : vector<2x32xf32>
    %34 = math.tanh %33 : vector<2x32xf32>
    %35 = vector.extract_strided_slice %7 {offsets = [10, 0], sizes = [2, 32], strides = [1, 1]} : vector<16x32xf32> to vector<2x32xf32>
    %36 = arith.truncf %34 : vector<2x32xf32> to vector<2x32xbf16>
    %cst_13 = arith.constant dense<0.000000e+00> : vector<2x32xf32>
    %37 = tpu.matmul %36, %8, %cst_13 {dimension_numbers = #tpu.dot_dimension_numbers<[1], [0], [0], [1], [0, 0, 1, 1], [], []>} : vector<2x32xbf16>, vector<32x32xbf16>, vector<2x32xf32> -> vector<2x32xf32>
    %38 = arith.addf %35, %37 : vector<2x32xf32>
    %39 = math.tanh %38 : vector<2x32xf32>
    %40 = vector.extract_strided_slice %7 {offsets = [12, 0], sizes = [2, 32], strides = [1, 1]} : vector<16x32xf32> to vector<2x32xf32>
    %41 = arith.truncf %39 : vector<2x32xf32> to vector<2x32xbf16>
    %cst_14 = arith.constant dense<0.000000e+00> : vector<2x32xf32>
    %42 = tpu.matmul %41, %8, %cst_14 {dimension_numbers = #tpu.dot_dimension_numbers<[1], [0], [0], [1], [0, 0, 1, 1], [], []>} : vector<2x32xbf16>, vector<32x32xbf16>, vector<2x32xf32> -> vector<2x32xf32>
    %43 = arith.addf %40, %42 : vector<2x32xf32>
    %44 = math.tanh %43 : vector<2x32xf32>
    %45 = vector.extract_strided_slice %7 {offsets = [14, 0], sizes = [2, 32], strides = [1, 1]} : vector<16x32xf32> to vector<2x32xf32>
    %46 = arith.truncf %44 : vector<2x32xf32> to vector<2x32xbf16>
    %cst_15 = arith.constant dense<0.000000e+00> : vector<2x32xf32>
    %47 = tpu.matmul %46, %8, %cst_15 {dimension_numbers = #tpu.dot_dimension_numbers<[1], [0], [0], [1], [0, 0, 1, 1], [], []>} : vector<2x32xbf16>, vector<32x32xbf16>, vector<2x32xf32> -> vector<2x32xf32>
    %48 = arith.addf %45, %47 : vector<2x32xf32>
    %49 = math.tanh %48 : vector<2x32xf32>
    %50 = tpu.concatenate %14, %19, %24, %29, %34, %39, %44, %49 in 0 : vector<2x32xf32>, vector<2x32xf32>, vector<2x32xf32>, vector<2x32xf32>, vector<2x32xf32>, vector<2x32xf32>, vector<2x32xf32>, vector<2x32xf32> -> vector<16x32xf32>
    %51 = arith.truncf %50 : vector<16x32xf32> to vector<16x32xbf16>
    %c0_16 = arith.constant 0 : index
    %c0_17 = arith.constant 0 : index
    %52 = vector.load %arg7[%c0_16, %c0_17] : memref<32x256xbf16, #tpu.memory_space<vmem>>, vector<32x256xbf16>
    %cst_18 = arith.constant dense<0.000000e+00> : vector<16x256xf32>
    %53 = tpu.matmul %51, %52, %cst_18 {dimension_numbers = #tpu.dot_dimension_numbers<[1], [0], [0], [1], [0, 0, 1, 1], [], []>} : vector<16x32xbf16>, vector<32x256xbf16>, vector<16x256xf32> -> vector<16x256xf32>
    %c0_19 = arith.constant 0 : index
    %c0_20 = arith.constant 0 : index
    %54 = vector.load %arg8[%c0_19, %c0_20] : memref<1x256xf32, #tpu.memory_space<vmem>>, vector<1x256xf32>
    %55 = vector.broadcast %54 : vector<1x256xf32> to vector<16x256xf32>
    %56 = arith.addf %53, %55 : vector<16x256xf32>
    %cst_21 = arith.constant 0.000000e+00 : f32
    %57 = vector.broadcast %cst_21 : f32 to vector<16x256xf32>
    %58 = arith.maximumf %56, %57 : vector<16x256xf32>
    %59 = arith.truncf %58 : vector<16x256xf32> to vector<16x256xbf16>
    %c0_22 = arith.constant 0 : index
    %c0_23 = arith.constant 0 : index
    %60 = vector.load %arg9[%c0_22, %c0_23] : memref<256x256xbf16, #tpu.memory_space<vmem>>, vector<256x256xbf16>
    %cst_24 = arith.constant dense<0.000000e+00> : vector<16x256xf32>
    %61 = tpu.matmul %59, %60, %cst_24 {dimension_numbers = #tpu.dot_dimension_numbers<[1], [0], [0], [1], [0, 0, 1, 1], [], []>} : vector<16x256xbf16>, vector<256x256xbf16>, vector<16x256xf32> -> vector<16x256xf32>
    %c0_25 = arith.constant 0 : index
    %c0_26 = arith.constant 0 : index
    %62 = vector.load %arg10[%c0_25, %c0_26] : memref<1x256xf32, #tpu.memory_space<vmem>>, vector<1x256xf32>
    %63 = vector.broadcast %62 : vector<1x256xf32> to vector<16x256xf32>
    %64 = arith.addf %61, %63 : vector<16x256xf32>
    %cst_27 = arith.constant 0.000000e+00 : f32
    %65 = vector.broadcast %cst_27 : f32 to vector<16x256xf32>
    %66 = arith.maximumf %64, %65 : vector<16x256xf32>
    %67 = arith.truncf %66 : vector<16x256xf32> to vector<16x256xbf16>
    %c0_28 = arith.constant 0 : index
    %c0_29 = arith.constant 0 : index
    %68 = vector.load %arg11[%c0_28, %c0_29] : memref<256x32xbf16, #tpu.memory_space<vmem>>, vector<256x32xbf16>
    %cst_30 = arith.constant dense<0.000000e+00> : vector<16x32xf32>
    %69 = tpu.matmul %67, %68, %cst_30 {dimension_numbers = #tpu.dot_dimension_numbers<[1], [0], [0], [1], [0, 0, 1, 1], [], []>} : vector<16x256xbf16>, vector<256x32xbf16>, vector<16x32xf32> -> vector<16x32xf32>
    %c0_31 = arith.constant 0 : index
    %c0_32 = arith.constant 0 : index
    %70 = vector.load %arg12[%c0_31, %c0_32] : memref<1x32xf32, #tpu.memory_space<vmem>>, vector<1x32xf32>
    %71 = vector.broadcast %70 : vector<1x32xf32> to vector<16x32xf32>
    %72 = arith.addf %69, %71 : vector<16x32xf32>
    %c0_33 = arith.constant 0 : index
    %c0_34 = arith.constant 0 : index
    %73 = vector.load %arg13[%c0_33, %c0_34] : memref<16x32xf32, #tpu.memory_space<vmem>>, vector<16x32xf32>
    tpu.vector_store %arg13[%c0_33, %c0_34], %72 {strides = array<i32>} : memref<16x32xf32, #tpu.memory_space<vmem>>, vector<16x32xf32>,
    %c0_35 = arith.constant 0 : index
    %c0_36 = arith.constant 0 : index
    %74 = vector.load %arg0[%c0_35, %c0_36] : memref<2x1xi32, #tpu.memory_space<vmem>>, vector<2x1xi32>
    %c1_i32 = arith.constant 1 : i32
    %75 = vector.broadcast %c1_i32 : i32 to vector<2x1xi32>
    %76 = arith.subi %74, %75 : vector<2x1xi32>
    %c0_37 = arith.constant 0 : index
    %77 = memref.load %arg1[%c0_37] : memref<1xi32, #tpu.memory_space<smem>>
    %c0_38 = arith.constant 0 : index
    %c0_39 = arith.constant 0 : index
    %78 = vector.load %arg5[%c0_38, %c0_39] : memref<64x32xbf16, #tpu.memory_space<vmem>>, vector<64x32xbf16>
    %79 = vector.shape_cast %0 : vector<1x32xf32> to vector<1x32xf32>
    %80 = vector.broadcast %79 : vector<1x32xf32> to vector<2x32xf32>
    %81 = vector.extract_strided_slice %72 {offsets = [14, 0], sizes = [2, 32], strides = [1, 1]} : vector<16x32xf32> to vector<2x32xf32>
    %cst_40 = arith.constant 0.000000e+00 : f32
    %82 = vector.broadcast %cst_40 : f32 to vector<2x32xf32>
    %c0_i32 = arith.constant 0 : i32
    %83 = arith.subi %77, %c0_i32 : i32
    %84 = arith.addi %c0_i32, %83 : i32
    %c1_i32_41 = arith.constant 1 : i32
    %85:3 = scf.for %arg15 = %c0_i32 to %84 step %c1_i32_41 iter_args(%arg16 = %81, %arg17 = %49, %arg18 = %82) -> (vector<2x32xf32>, vector<2x32xf32>, vector<2x32xf32>)  : i32 {
      %87 = tpu.concatenate %arg16, %arg17 in 1 : vector<2x32xf32>, vector<2x32xf32> -> vector<2x64xf32>
      %88 = arith.truncf %87 : vector<2x64xf32> to vector<2x64xbf16>
      %cst_44 = arith.constant dense<0.000000e+00> : vector<2x32xf32>
      %89 = tpu.matmul %88, %78, %cst_44 {dimension_numbers = #tpu.dot_dimension_numbers<[1], [0], [0], [1], [0, 0, 1, 1], [], []>} : vector<2x64xbf16>, vector<64x32xbf16>, vector<2x32xf32> -> vector<2x32xf32>
      %90 = arith.addf %89, %80 : vector<2x32xf32>
      %91 = math.tanh %90 : vector<2x32xf32>
      %92 = arith.truncf %91 : vector<2x32xf32> to vector<2x32xbf16>
      %c0_45 = arith.constant 0 : index
      %c0_46 = arith.constant 0 : index
      %93 = vector.load %arg7[%c0_45, %c0_46] : memref<32x256xbf16, #tpu.memory_space<vmem>>, vector<32x256xbf16>
      %cst_47 = arith.constant dense<0.000000e+00> : vector<2x256xf32>
      %94 = tpu.matmul %92, %93, %cst_47 {dimension_numbers = #tpu.dot_dimension_numbers<[1], [0], [0], [1], [0, 0, 1, 1], [], []>} : vector<2x32xbf16>, vector<32x256xbf16>, vector<2x256xf32> -> vector<2x256xf32>
      %c0_48 = arith.constant 0 : index
      %c0_49 = arith.constant 0 : index
      %95 = vector.load %arg8[%c0_48, %c0_49] : memref<1x256xf32, #tpu.memory_space<vmem>>, vector<1x256xf32>
      %96 = vector.broadcast %95 : vector<1x256xf32> to vector<2x256xf32>
      %97 = arith.addf %94, %96 : vector<2x256xf32>
      %cst_50 = arith.constant 0.000000e+00 : f32
      %98 = vector.broadcast %cst_50 : f32 to vector<2x256xf32>
      %99 = arith.maximumf %97, %98 : vector<2x256xf32>
      %100 = arith.truncf %99 : vector<2x256xf32> to vector<2x256xbf16>
      %c0_51 = arith.constant 0 : index
      %c0_52 = arith.constant 0 : index
      %101 = vector.load %arg9[%c0_51, %c0_52] : memref<256x256xbf16, #tpu.memory_space<vmem>>, vector<256x256xbf16>
      %cst_53 = arith.constant dense<0.000000e+00> : vector<2x256xf32>
      %102 = tpu.matmul %100, %101, %cst_53 {dimension_numbers = #tpu.dot_dimension_numbers<[1], [0], [0], [1], [0, 0, 1, 1], [], []>} : vector<2x256xbf16>, vector<256x256xbf16>, vector<2x256xf32> -> vector<2x256xf32>
      %c0_54 = arith.constant 0 : index
      %c0_55 = arith.constant 0 : index
      %103 = vector.load %arg10[%c0_54, %c0_55] : memref<1x256xf32, #tpu.memory_space<vmem>>, vector<1x256xf32>
      %104 = vector.broadcast %103 : vector<1x256xf32> to vector<2x256xf32>
      %105 = arith.addf %102, %104 : vector<2x256xf32>
      %cst_56 = arith.constant 0.000000e+00 : f32
      %106 = vector.broadcast %cst_56 : f32 to vector<2x256xf32>
      %107 = arith.maximumf %105, %106 : vector<2x256xf32>
      %108 = arith.truncf %107 : vector<2x256xf32> to vector<2x256xbf16>
      %c0_57 = arith.constant 0 : index
      %c0_58 = arith.constant 0 : index
      %109 = vector.load %arg11[%c0_57, %c0_58] : memref<256x32xbf16, #tpu.memory_space<vmem>>, vector<256x32xbf16>
      %cst_59 = arith.constant dense<0.000000e+00> : vector<2x32xf32>
      %110 = tpu.matmul %108, %109, %cst_59 {dimension_numbers = #tpu.dot_dimension_numbers<[1], [0], [0], [1], [0, 0, 1, 1], [], []>} : vector<2x256xbf16>, vector<256x32xbf16>, vector<2x32xf32> -> vector<2x32xf32>
      %c0_60 = arith.constant 0 : index
      %c0_61 = arith.constant 0 : index
      %111 = vector.load %arg12[%c0_60, %c0_61] : memref<1x32xf32, #tpu.memory_space<vmem>>, vector<1x32xf32>
      %112 = vector.broadcast %111 : vector<1x32xf32> to vector<2x32xf32>
      %113 = arith.addf %110, %112 : vector<2x32xf32>
      %114 = vector.broadcast %arg15 : i32 to vector<2x1xi32>
      %115 = arith.cmpi eq, %76, %114 : vector<2x1xi32>
      %116 = vector.shape_cast %115 : vector<2x1xi1> to vector<2x1xi1>
      %117 = vector.broadcast %116 : vector<2x1xi1> to vector<2x32xi1>
      %118 = arith.select %117, %113, %arg18 : vector<2x32xi1>, vector<2x32xf32>
      scf.yield %113, %91, %118 : vector<2x32xf32>, vector<2x32xf32>, vector<2x32xf32>
    }
    %c0_42 = arith.constant 0 : index
    %c0_43 = arith.constant 0 : index
    %86 = vector.load %arg14[%c0_42, %c0_43] : memref<2x32xf32, #tpu.memory_space<vmem>>, vector<2x32xf32>
    tpu.vector_store %arg14[%c0_42, %c0_43], %85#2 {strides = array<i32>} : memref<2x32xf32, #tpu.memory_space<vmem>>, vector<2x32xf32>,
    return
  }
}

</mosaic_0001>

<bundles_post_ra>
// kernel: forward.1
= control target key start
LH: loop header
LB: loop body
LE: loop exit
PB: predicated region body
PF: predicated region fallthrough
CT: control target
= control target key end

     0   :  { %21 = vsyncpa [#allocation4], 0  ;;  %s2091_s16 = smov [#allocation3]   ;;  %s2092_s18 = smov 128   ;;  %s2508_s0 = inlined_call_operand.vmem [shape: s32[2,1], index: 0, kind: input, shape index: {}]   ;;  %s2509_s1 = inlined_call_operand.<no memory space> [shape: s32[1], index: 1, kind: input, shape index: {}]   ;;  %s2510_s2 = inlined_call_operand.vmem [shape: f32[16,32], index: 2, kind: input, shape index: {}]   ;;  %s2511_s3 = inlined_call_operand.vmem [shape: bf16[32,32], index: 3, kind: input, shape index: {}]   ;;  %s2512_s4 = inlined_call_operand.vmem [shape: bf16[32,32], index: 4, kind: input, shape index: {}]   ;;  %s2513_s5 = inlined_call_operand.vmem [shape: bf16[64,32], index: 5, kind: input, shape index: {}]   ;;  %s2514_s6 = inlined_call_operand.vmem [shape: f32[1,32], index: 6, kind: input, shape index: {}]   ;;  %s2515_s7 = inlined_call_operand.vmem [shape: bf16[32,256], index: 7, kind: input, shape index: {}]   ;;  %s2516_s8 = inlined_call_operand.vmem [shape: f32[1,256], index: 8, kind: input, shape index: {}]   ;;  %s2517_s9 = inlined_call_operand.hbm [shape: bf16[256,256], index: 9, kind: input, shape index: {}]   ;;  %s2518_s10 = inlined_call_operand.vmem [shape: f32[1,256], index: 10, kind: input, shape index: {}]   ;;  %s2519_s11 = inlined_call_operand.vmem [shape: bf16[256,32], index: 11, kind: input, shape index: {}]   ;;  %s2520_s12 = inlined_call_operand.vmem [shape: f32[1,32], index: 12, kind: input, shape index: {}]   ;;  %s2521_s13 = inlined_call_operand.vmem [shape: f32[16,32], index: 13, kind: output, shape index: {0}]   ;;  %s2522_s14 = inlined_call_operand.vmem [shape: f32[2,32], index: 14, kind: output, shape index: {1}]  }
   0x1   :  { %s44_s15 = sshll.u32 %s2517_s9, 4  ;;  %s46_s17 = sshll.u32 %s2091_s16, 4  ;;  %s45_s15 = int_to_ptr.hbm [resolvable:$true] %s44_s15  ;;  %s47_s17 = int_to_ptr.vmem [resolvable:$true] %s46_s17 }
   0x2   :  { %s2093_s19 = smov 8  }
   0x3   :  { %52 = dma.hbm_to_vmem [thread:$0]  %s45_s15, 4096, %s47_s17, [#allocation4], %s2092_s18, %s2092_s18, %s2093_s19  }
   0x4   :  { %2069 = dma.done.wait [#allocation4], 4096  }
   0x5   :  { %2070 = vsyncadd [#allocation4], 4294963200  ;;  %v799_v0 = vld [vmem:[%s2508_s0] sm:$0x3]  ;;  %v2186_v2 = vld [vmem:[%s2513_s5] sm:$0xf0] }
   0x6   :  { %v2181_v1 = vld [vmem:[%s2513_s5] sm:$0xf]  ;;  %v2188_v3 = vadd.s32 4294967295, %v799_v0  ;;  %v2193_v4 = vld [vmem:[%s2513_s5 + $0x8] sm:$0xf]  ;;  %vm87_vm0 = vcmask 261120  }
   0x7   :  { %v2198_v5 = vld [vmem:[%s2513_s5 + $0x8] sm:$0xf0]  ;;  %v2206_v7 = vld [vmem:[%s2513_s5 + $0x10] sm:$0xf]  ;;  %v2211_v8 = vld [vmem:[%s2513_s5 + $0x10] sm:$0xf0] }
   0x8   :  { %v1846_v6 = vld [vmem:[%s2511_s3 + $0x8] sm:$0xff]  ;;  %v2216_v9 = vld [vmem:[%s2513_s5 + $0x18] sm:$0xf]  ;;  %v2221_v10 = vld [vmem:[%s2513_s5 + $0x18] sm:$0xf0]  ;;  %v2094_v17 = vmov 0  }
   0x9   :  { %97 = vmatpush.bf16.msra.mxu1 %v1846_v6  ;;  %v1845_v11 = vld [vmem:[%s2511_s3] sm:$0xff]  ;;  %v66_v13 = vld [vmem:[%s2510_s2 + $0x8] sm:$0xff]  ;;  %vm300_vm1 = vcmask 1041408   ;;  %vm302_vm2 = vcmask 1043456   ;;  %vm304_vm3 = vcmask 1045504   ;;  %p1617_p0 = scmp.le.s32.totalorder %s2509_s1, 0 }
   0xa   :  { %v65_v12 = vld [vmem:[%s2510_s2] sm:$0xff]  ;;  %v1848_v14 = vld [vmem:[%s2512_s4 + $0x8] sm:$0xff]  ;;  %v1416_v0 = vld [vmem:[%s2515_s7 + $0x10] sm:$0xf]  ;;  %s2379_s9 = smov (!%p1617_p0), 0  }
   0xb   :  { %v67_v15 = vpack.c.bf16 %v66_v13, %v65_v12  ;;  %149 = vmatpush.bf16.msra.mxu2 %v1848_v14  ;;  %173 = vmatpush.bf16.msra.mxu3 %v1848_v14  ;;  %v1847_v16 = vld [vmem:[%s2512_s4] sm:$0xff]  ;;  %v1852_v6 = vld [vmem:[%s2515_s7 + $0x14] sm:$0xf0] }
   0xc   :  { %197 = vmatpush.bf16.msra.mxu0 %v1848_v14  ;;  %v2242_v19 = vld [vmem:[%s2514_s6] ss:$0 sm:$0xff] }
   0xd   :  { %98 = vmatpush.bf16.msra.mxu1 %v1845_v11  ;;  %v1417_v11 = vor.u32 %v1852_v6, %v1416_v0  ;;  %v1530_v6 = vld [vmem:[#allocation3 + $0xd0] sm:$0xf] }
   0xf   :  { %150 = vmatpush.bf16.msra.mxu2 %v1847_v16  ;;  %174 = vmatpush.bf16.msra.mxu3 %v1847_v16 }
  0x10   :  { %1390 = vmatmul.msk.bf16.vlgmr.msra.gmra.mxu1 %vm87_vm0, %v67_v15  ;;  %198 = vmatpush.bf16.msra.mxu0 %v1847_v16 }
  0x11   :  { %130 = vmatpush.bf16.msrb.mxu1 %v1848_v14 }
  0x13   :  { %240 = vmatpush.bf16.msrb.mxu2 %v1848_v14  ;;  %264 = vmatpush.bf16.msrb.mxu3 %v1848_v14 }
  0x14   :  { %288 = vmatpush.bf16.msrb.mxu0 %v1848_v14 }
  0x15   :  { %131 = vmatpush.bf16.msrb.mxu1 %v1847_v16 }
  0x17   :  { %241 = vmatpush.bf16.msrb.mxu2 %v1847_v16  ;;  %265 = vmatpush.bf16.msrb.mxu3 %v1847_v16 }
  0x18   :  { %289 = vmatpush.bf16.msrb.mxu0 %v1847_v16 }
  0x19   :  { %221 = vmatpush.bf16.msra.mxu1 %v1848_v14 }
  0x1d   :  { %222 = vmatpush.bf16.msra.mxu1 %v1847_v16 }
  0x20   :  { %132 = vmatmul.bf16.vlgmr.msrb.gmra.mxu1 %v2094_v17 }
  0x21   :  { %349 = vmatpush.bf16.msrb.mxu1 %v1417_v11  ;;  %v1880_v11 = vld [vmem:[#allocation3 + $0xd4] sm:$0xf0] }
  0x8d   :  { %v100_v18 = vpop.f32.mrf.mxu1 }
  0x8e   :  { %v101_v22 = vadd.f32 %v2242_v19, %v100_v18 }
  0x95   :  { %v102_v20 = vpop.f32.mrf.mxu1 }
  0x96   :  { %v2245_v21 = vadd.f32 %v2242_v19, %v102_v20 }
  0x9d   :  { %v133_v23 = vpop.f32.mrf.mxu1 }
  0x9e   :  { %v137_v24 = vadd.f32 %v133_v23, %v101_v22  ;;  %v1851_v23 = vld [vmem:[%s2515_s7 + $0x14] sm:$0xf] }
  0xa0   :  { %2005 = vtanh.f32 %v137_v24  ;;  %v1418_v24 = vld [vmem:[%s2515_s7 + $0x18] sm:$0xf0] }
  0xa5   :  { %v135_v25 = vpop.f32.mrf.mxu1 }
  0xa6   :  { %v2006_v26 = vpop.eup %2005  ;;  %v1421_v25 = vor.u32 %v1851_v23, %v1418_v24 }
  0xa7   :  { %v139_v27 = vpack.c.bf16 %v2006_v26, %v2006_v26 }
  0xa9   :  { %1399 = vmatmul.msk.bf16.vlgmr.msra.gmra.mxu2 %vm87_vm0, %v139_v27  ;;  %v1850_v27 = vld [vmem:[%s2515_s7 + $0x4] sm:$0xf0] }
  0xaa   :  { %363 = vmatpush.bf16.msra.mxu2 %v1421_v25 }
 0x12c   :  { %v152_v28 = vpop.f32.mrf.mxu2 }
 0x12d   :  { %v157_v29 = vrot.slane %v152_v28, 6  ;;  %v1849_v28 = vld [vmem:[%s2515_s7 + $0x4] sm:$0xf] }
 0x12f   :  { %v159_v30 = vadd.f32 %v157_v29, %v101_v22 }
 0x131   :  { %2007 = vtanh.f32 %v159_v30  ;;  %v1410_v30 = vld [vmem:[%s2515_s7 + $0x8] sm:$0xf0] }
 0x134   :  { %v154_v31 = vpop.f32.mrf.mxu2 }
 0x135   :  { %v1413_v31 = vor.u32 %v1849_v28, %v1410_v30 }
 0x137   :  { %v2008_v32 = vpop.eup %2007  ;;  %364 = vmatpush.bf16.msra.mxu2 %v1413_v31  ;;  %v1450_v31 = vld [vmem:[#allocation3 + $0x30] sm:$0xf] }
 0x138   :  { %v161_v33 = vpack.c.bf16 %v2008_v32, %v2008_v32  ;;  %v301_v40 = vsel %vm300_vm1, %v2006_v26, %v2008_v32  ;;  %v1408_v26 = vld [vmem:[%s2515_s7] sm:$0xf]  ;;  %v1482_v32 = vld [vmem:[#allocation3 + $0x70] sm:$0xf] }
 0x139   :  { %v1409_v29 = vor.u32 %v1850_v27, %v1408_v26 }
 0x13a   :  { %v163_v34 = vrot.slane %v161_v33, 1  ;;  %v1868_v33 = vld [vmem:[#allocation3 + $0x74] sm:$0xf0] }
 0x13b   :  { %350 = vmatpush.bf16.msrb.mxu1 %v1409_v29 }
 0x13c   :  { %1400 = vmatmul.msk.bf16.vlgmr.msra.gmra.mxu3 %vm87_vm0, %v163_v34  ;;  %v1867_v34 = vld [vmem:[#allocation3 + $0x74] sm:$0xf] }
 0x1bf   :  { %v176_v35 = vpop.f32.mrf.mxu3 }
 0x1c0   :  { %v181_v36 = vrot.slane %v176_v35, 4  ;;  %v1483_v35 = vor.u32 %v1868_v33, %v1482_v32  ;;  %v1860_v32 = vld [vmem:[#allocation3 + $0x34] sm:$0xf0]  ;;  %v1859_v33 = vld [vmem:[#allocation3 + $0x34] sm:$0xf] }
 0x1c2   :  { %v183_v37 = vadd.f32 %v181_v36, %v101_v22  ;;  %v1484_v36 = vld [vmem:[#allocation3 + $0x78] sm:$0xf0]  ;;  %575 = vmatpush.bf16.msra.mxu3 %v1483_v35 }
 0x1c4   :  { %2009 = vtanh.f32 %v183_v37  ;;  %v1474_v37 = vld [vmem:[#allocation3 + $0x60] sm:$0xf] }
 0x1c7   :  { %v178_v38 = vpop.f32.mrf.mxu3 }
 0x1c8   :  { %v1866_v38 = vld [vmem:[#allocation3 + $0x64] sm:$0xf0] }
 0x1ca   :  { %v2010_v39 = vpop.eup %2009 }
 0x1cb   :  { %v185_v41 = vpack.c.bf16 %v2010_v39, %v2010_v39  ;;  %v303_v42 = vsel %vm302_vm2, %v301_v40, %v2010_v39  ;;  %v1487_v39 = vor.u32 %v1867_v34, %v1484_v36  ;;  %v1865_v40 = vld [vmem:[#allocation3 + $0x64] sm:$0xf]  ;;  %v1452_v34 = vld [vmem:[#allocation3 + $0x38] sm:$0xf0]  ;;  %v1522_v36 = vld [vmem:[#allocation3 + $0xc0] sm:$0xf] }
 0x1cc   :  { %v1455_v35 = vor.u32 %v1859_v33, %v1452_v34  ;;  %v1892_v33 = vld [vmem:[%s2519_s11 + $0x38] sm:$0xff]  ;;  %v1891_v34 = vld [vmem:[%s2519_s11 + $0x30] sm:$0xff] }
 0x1cd   :  { %v187_v43 = vrot.slane %v185_v41, 2  ;;  %v1476_v41 = vld [vmem:[#allocation3 + $0x68] sm:$0xf0] }
 0x1cf   :  { %1401 = vmatmul.msk.bf16.vlgmr.msra.gmra.mxu0 %vm87_vm0, %v187_v43  ;;  %v1475_v43 = vor.u32 %v1866_v38, %v1474_v37  ;;  %v1878_v37 = vld [vmem:[#allocation3 + $0xc4] sm:$0xf0]  ;;  %v1877_v38 = vld [vmem:[#allocation3 + $0xc4] sm:$0xf] }
 0x1d1   :  { %576 = vmatpush.bf16.msra.mxu3 %v1475_v43 }
 0x24c   :  { %v200_v44 = vpop.f32.mrf.mxu0 }
 0x24d   :  { %v205_v45 = vrot.slane %v200_v44, 2  ;;  %v1884_v44 = vld [vmem:[#allocation3 + $0xf4] sm:$0xf0] }
 0x24f   :  { %v207_v46 = vadd.f32 %v205_v45, %v101_v22  ;;  %v1883_v45 = vld [vmem:[#allocation3 + $0xf4] sm:$0xf] }
 0x251   :  { %2011 = vtanh.f32 %v207_v46  ;;  %v1548_v46 = vld [vmem:[#allocation3 + $0xf8] sm:$0xf0] }
 0x254   :  { %v202_v47 = vpop.f32.mrf.mxu0 }
 0x255   :  { %v1479_v47 = vor.u32 %v1865_v40, %v1476_v41  ;;  %v1524_v40 = vld [vmem:[#allocation3 + $0xc8] sm:$0xf0]  ;;  %v1442_v41 = vld [vmem:[#allocation3 + $0x20] sm:$0xf] }
 0x257   :  { %v2012_v48 = vpop.eup %2011 }
 0x258   :  { %v209_v49 = vpack.c.bf16 %v2012_v48, %v2012_v48  ;;  %v2254_v50 = vsel %vm304_vm3, %v303_v42, %v2012_v48  ;;  %v1546_v42 = vld [vmem:[#allocation3 + $0xf0] sm:$0xf] }
 0x259   :  { %v1547_v48 = vor.u32 %v1884_v44, %v1546_v42  ;;  %v1857_v42 = vld [vmem:[#allocation3 + $0x24] sm:$0xf]  ;;  %v1444_v44 = vld [vmem:[#allocation3 + $0x28] sm:$0xf0] }
 0x25a   :  { %v211_v51 = vrot.slane %v209_v49, 3  ;;  %v1551_v49 = vor.u32 %v1883_v45, %v1548_v46  ;;  %v1447_v45 = vor.u32 %v1857_v42, %v1444_v44  ;;  %v1514_v46 = vld [vmem:[#allocation3 + $0xb0] sm:$0xf] }
 0x25b   :  { %589 = vmatpush.bf16.msra.mxu0 %v1547_v48 }
 0x25c   :  { %1402 = vmatmul.msk.bf16.vlgmr.msra.gmra.mxu1 %vm87_vm0, %v211_v51  ;;  %v1466_v51 = vld [vmem:[#allocation3 + $0x50] sm:$0xf] }
 0x25d   :  { %603 = vmatpush.bf16.msra.mxu1 %v1487_v39  ;;  %v1523_v39 = vor.u32 %v1878_v37, %v1522_v36 }
 0x261   :  { %604 = vmatpush.bf16.msra.mxu1 %v1479_v47  ;;  %v1876_v47 = vld [vmem:[#allocation3 + $0xb4] sm:$0xf0] }
 0x262   :  { %v1515_v48 = vor.u32 %v1876_v47, %v1514_v46 }
 0x2d9   :  { %v224_v52 = vpop.f32.mrf.mxu1 }
 0x2da   :  { %v228_v53 = vadd.f32 %v224_v52, %v2245_v21  ;;  %v1864_v52 = vld [vmem:[#allocation3 + $0x54] sm:$0xf0] }
 0x2dc   :  { %2013 = vtanh.f32 %v228_v53  ;;  %v1863_v53 = vld [vmem:[#allocation3 + $0x54] sm:$0xf] }
 0x2e1   :  { %v226_v54 = vpop.f32.mrf.mxu1 }
 0x2e2   :  { %v2014_v55 = vpop.eup %2013  ;;  %v1468_v54 = vld [vmem:[#allocation3 + $0x58] sm:$0xf0] }
 0x2e3   :  { %v230_v56 = vpack.c.bf16 %v2014_v55, %v2014_v55  ;;  %v1471_v0 = vor.u32 %v1863_v53, %v1468_v54  ;;  %v1434_v53 = vld [vmem:[#allocation3 + $0x10] sm:$0xf]  ;;  %v1856_v54 = vld [vmem:[#allocation3 + $0x14] sm:$0xf0] }
 0x2e5   :  { %1403 = vmatmul.msk.bf16.vlgmr.msrb.gmra.mxu2 %vm87_vm0, %v230_v56  ;;  %v1882_v56 = vld [vmem:[#allocation3 + $0xe4] sm:$0xf0]  ;;  %605 = vmatpush.bf16.msra.mxu1 %v1471_v0 }
 0x2e6   :  { %617 = vmatpush.bf16.msrb.mxu2 %v1551_v49  ;;  %v1875_v49 = vld [vmem:[#allocation3 + $0xb4] sm:$0xf] }
 0x368   :  { %v243_v57 = vpop.f32.mrf.mxu2 }
 0x369   :  { %v248_v58 = vrot.slane %v243_v57, 6 }
 0x36b   :  { %v250_v59 = vadd.f32 %v248_v58, %v2245_v21  ;;  %v1881_v58 = vld [vmem:[#allocation3 + $0xe4] sm:$0xf] }
 0x36d   :  { %2015 = vtanh.f32 %v250_v59  ;;  %v1540_v59 = vld [vmem:[#allocation3 + $0xe8] sm:$0xf0] }
 0x370   :  { %v245_v60 = vpop.f32.mrf.mxu2 }
 0x371   :  { %v1467_v60 = vor.u32 %v1864_v52, %v1466_v51  ;;  %v1516_v51 = vld [vmem:[#allocation3 + $0xb8] sm:$0xf0] }
 0x372   :  { %v1519_v52 = vor.u32 %v1875_v49, %v1516_v51  ;;  %v1890_v51 = vld [vmem:[%s2519_s11 + $0x28] sm:$0xff] }
 0x373   :  { %v2016_v61 = vpop.eup %2015  ;;  %577 = vmatpush.bf16.msra.mxu3 %v1467_v60  ;;  %v1874_v60 = vld [vmem:[#allocation3 + $0xa4] sm:$0xf0] }
 0x374   :  { %v252_v62 = vpack.c.bf16 %v2016_v61, %v2016_v61  ;;  %v306_v17 = vsel %vm300_vm1, %v2014_v55, %v2016_v61  ;;  %v1538_v55 = vld [vmem:[#allocation3 + $0xe0] sm:$0xf]  ;;  %v1543_v61 = vor.u32 %v1881_v58, %v1540_v59 }
 0x375   :  { %v1539_v57 = vor.u32 %v1882_v56, %v1538_v55  ;;  %v1855_v55 = vld [vmem:[#allocation3 + $0x14] sm:$0xf]  ;;  %v1435_v56 = vor.u32 %v1856_v54, %v1434_v53  ;;  %v1506_v59 = vld [vmem:[#allocation3 + $0xa0] sm:$0xf]  ;;  %v1898_v54 = vld [vmem:[%s2519_s11 + $0x68] sm:$0xff] }
 0x376   :  { %v254_v63 = vrot.slane %v252_v62, 1  ;;  %v1458_v62 = vld [vmem:[#allocation3 + $0x40] sm:$0xf]  ;;  %618 = vmatpush.bf16.msrb.mxu2 %v1543_v61  ;;  %v1873_v61 = vld [vmem:[#allocation3 + $0xa4] sm:$0xf] }
 0x377   :  { %590 = vmatpush.bf16.msra.mxu0 %v1539_v57  ;;  %v1436_v57 = vld [vmem:[#allocation3 + $0x18] sm:$0xf0]  ;;  %v1889_v53 = vld [vmem:[%s2519_s11 + $0x20] sm:$0xff] }
 0x378   :  { %1404 = vmatmul.msk.bf16.vlgmr.msrb.gmra.mxu3 %vm87_vm0, %v254_v63  ;;  %v1862_v63 = vld [vmem:[#allocation3 + $0x44] sm:$0xf0]  ;;  %v1439_v58 = vor.u32 %v1855_v55, %v1436_v57  ;;  %v1888_v55 = vld [vmem:[%s2519_s11 + $0x18] sm:$0xff]  ;;  %v1887_v57 = vld [vmem:[%s2519_s11 + $0x10] sm:$0xff] }
 0x3fb   :  { %v267_v12 = vpop.f32.mrf.mxu3 }
 0x3fc   :  { %v272_v13 = vrot.slane %v267_v12, 4  ;;  %v1879_v12 = vld [vmem:[#allocation3 + $0xd4] sm:$0xf] }
 0x3fe   :  { %v274_v14 = vadd.f32 %v272_v13, %v2245_v21  ;;  %v1861_v13 = vld [vmem:[#allocation3 + $0x44] sm:$0xf] }
 0x400   :  { %2017 = vtanh.f32 %v274_v14  ;;  %v1460_v14 = vld [vmem:[#allocation3 + $0x48] sm:$0xf0] }
 0x403   :  { %v269_v15 = vpop.f32.mrf.mxu3 }
 0x404   :  { %v1532_v15 = vld [vmem:[#allocation3 + $0xd8] sm:$0xf0] }
 0x406   :  { %v2018_v16 = vpop.eup %2017 }
 0x407   :  { %v276_v18 = vpack.c.bf16 %v2018_v16, %v2018_v16  ;;  %v2270_v20 = vsel %vm302_vm2, %v306_v17, %v2018_v16  ;;  %v1531_v16 = vor.u32 %v1880_v11, %v1530_v6  ;;  %v1535_v17 = vor.u32 %v1879_v12, %v1532_v15  ;;  %v1426_v6 = vld [vmem:[#allocation3] sm:$0xf]  ;;  %v1854_v11 = vld [vmem:[#allocation3 + $0x4] sm:$0xf0]  ;;  %v1853_v12 = vld [vmem:[#allocation3 + $0x4] sm:$0xf] }
 0x409   :  { %v278_v22 = vrot.slane %v276_v18, 2  ;;  %v1459_v18 = vor.u32 %v1862_v63, %v1458_v62  ;;  %591 = vmatpush.bf16.msra.mxu0 %v1531_v16  ;;  %619 = vmatpush.bf16.msrb.mxu2 %v1535_v17  ;;  %v1507_v62 = vor.u32 %v1874_v60, %v1506_v59  ;;  %v1508_v63 = vld [vmem:[#allocation3 + $0xa8] sm:$0xf0]  ;;  %v1498_v16 = vld [vmem:[#allocation3 + $0x90] sm:$0xf] }
 0x40a   :  { %v1511_v0 = vor.u32 %v1873_v61, %v1508_v63  ;;  %v1872_v17 = vld [vmem:[#allocation3 + $0x94] sm:$0xf0]  ;;  %v1886_v59 = vld [vmem:[%s2519_s11 + $0x8] sm:$0xff]  ;;  %v1895_v60 = vld [vmem:[%s2519_s11 + $0x50] sm:$0xff] }
 0x40b   :  { %1405 = vmatmul.msk.bf16.vlgmr.msrb.gmra.mxu0 %vm87_vm0, %v278_v22  ;;  %v1463_v22 = vor.u32 %v1861_v13, %v1460_v14  ;;  %578 = vmatpush.bf16.msra.mxu3 %v1459_v18  ;;  %v1427_v13 = vor.u32 %v1854_v11, %v1426_v6  ;;  %v1428_v14 = vld [vmem:[#allocation3 + $0x8] sm:$0xf0]  ;;  %v1871_v18 = vld [vmem:[#allocation3 + $0x94] sm:$0xf]  ;;  %v1885_v61 = vld [vmem:[%s2519_s11] sm:$0xff] }
 0x40c   :  { %v1431_v15 = vor.u32 %v1853_v12, %v1428_v14  ;;  %v1893_v63 = vld [vmem:[%s2519_s11 + $0x40] sm:$0xff] }
 0x40d   :  { %606 = vmatpush.bf16.msra.mxu1 %v1463_v22  ;;  %592 = vmatpush.bf16.msra.mxu0 %v1523_v39  ;;  %v1499_v22 = vor.u32 %v1872_v17, %v1498_v16  ;;  %v409_v6 = vld [vmem:[%s2518_s10] sm:$0x3] }
 0x40e   :  { %v412_v16 = vperm.slane %v409_v6, 1 }
 0x411   :  { %607 = vmatpush.bf16.msra.mxu1 %v1455_v35  ;;  %593 = vmatpush.bf16.msra.mxu0 %v1515_v48  ;;  %v314_v35 = vld [vmem:[%s2516_s8] sm:$0x3] }
 0x412   :  { %v316_v37 = vperm.slane %v314_v35, 0 }
 0x415   :  { %608 = vmatpush.bf16.msra.mxu1 %v1447_v45  ;;  %594 = vmatpush.bf16.msra.mxu0 %v1507_v62  ;;  %v1894_v62 = vld [vmem:[%s2519_s11 + $0x48] sm:$0xff] }
 0x419   :  { %609 = vmatpush.bf16.msra.mxu1 %v1439_v58  ;;  %595 = vmatpush.bf16.msra.mxu0 %v1499_v22  ;;  %v1896_v58 = vld [vmem:[%s2519_s11 + $0x58] sm:$0xff] }
 0x41d   :  { %610 = vmatpush.bf16.msra.mxu1 %v1431_v15 }
 0x488   :  { %v291_v23 = vpop.f32.mrf.mxu0 }
 0x489   :  { %v296_v24 = vrot.slane %v291_v23, 2  ;;  %v1500_v23 = vld [vmem:[#allocation3 + $0x98] sm:$0xf0] }
 0x48b   :  { %v298_v25 = vadd.f32 %v296_v24, %v2245_v21  ;;  %v1451_v21 = vor.u32 %v1860_v32, %v1450_v31  ;;  %v1503_v24 = vor.u32 %v1871_v18, %v1500_v23  ;;  %v1492_v31 = vld [vmem:[#allocation3 + $0x88] sm:$0xf0] }
 0x48d   :  { %2019 = vtanh.f32 %v298_v25  ;;  %579 = vmatpush.bf16.msra.mxu3 %v1451_v21  ;;  %v1490_v25 = vld [vmem:[#allocation3 + $0x80] sm:$0xf]  ;;  %v1900_v21 = vld [vmem:[%s2519_s11 + $0x78] sm:$0xff] }
 0x490   :  { %v293_v26 = vpop.f32.mrf.mxu0 }
 0x491   :  { %v1870_v26 = vld [vmem:[#allocation3 + $0x84] sm:$0xf0] }
 0x493   :  { %v2292_v27 = vpop.eup %2019 }
 0x494   :  { %v814_v28 = vrot.slane %v2292_v27, 6   ;;  %v308_v29 = vsel %vm304_vm3, %v2270_v20, %v2292_v27  ;;  %v1527_v20 = vor.u32 %v1877_v38, %v1524_v40 }
 0x495   :  { %v309_v30 = vpack.c.bf16 %v308_v29, %v2254_v50  ;;  %v1858_v50 = vld [vmem:[#allocation3 + $0x24] sm:$0xf0]  ;;  %v1869_v29 = vld [vmem:[#allocation3 + $0x84] sm:$0xf] }
 0x496   :  { %v1443_v43 = vor.u32 %v1858_v50, %v1442_v41  ;;  %620 = vmatpush.bf16.msrb.mxu2 %v1527_v20  ;;  %v1495_v32 = vor.u32 %v1869_v29, %v1492_v31  ;;  %v317_v20 = vperm.slane %v314_v35, 1 }
 0x497   :  { %1422 = vmatmul.msk.bf16.vlgmr.msrb.gmra.mxu1 %vm87_vm0, %v309_v30  ;;  %1423 = vmatmul.msk.bf16.vlgmr.msra.gmra.mxu2 %vm87_vm0, %v309_v30  ;;  %v1491_v30 = vor.u32 %v1870_v26, %v1490_v25 }
 0x498   :  { %580 = vmatpush.bf16.msra.mxu3 %v1443_v43 }
 0x499   :  { %596 = vmatpush.bf16.msra.mxu0 %v1491_v30 }
 0x49a   :  { %621 = vmatpush.bf16.msrb.mxu2 %v1519_v52  ;;  %v1899_v52 = vld [vmem:[%s2519_s11 + $0x70] sm:$0xff] }
 0x49c   :  { %581 = vmatpush.bf16.msra.mxu3 %v1435_v56  ;;  %v1897_v56 = vld [vmem:[%s2519_s11 + $0x60] sm:$0xff] }
 0x49d   :  { %783 = vmatpush.bf16.msrb.mxu0 %v1900_v21 }
 0x49e   :  { %622 = vmatpush.bf16.msrb.mxu2 %v1511_v0 }
 0x4a0   :  { %582 = vmatpush.bf16.msra.mxu3 %v1427_v13  ;;  %v411_v13 = vperm.slane %v409_v6, 0 }
 0x4a1   :  { %784 = vmatpush.bf16.msrb.mxu0 %v1899_v52 }
 0x4a2   :  { %623 = vmatpush.bf16.msrb.mxu2 %v1503_v24 }
 0x4a4   :  { %769 = vmatpush.bf16.msrb.mxu3 %v1892_v33 }
 0x4a5   :  { %785 = vmatpush.bf16.msrb.mxu0 %v1898_v54 }
 0x4a6   :  { %624 = vmatpush.bf16.msrb.mxu2 %v1495_v32 }
 0x4a8   :  { %770 = vmatpush.bf16.msrb.mxu3 %v1891_v34 }
 0x4a9   :  { %786 = vmatpush.bf16.msrb.mxu0 %v1897_v56 }
 0x4ac   :  { %771 = vmatpush.bf16.msrb.mxu3 %v1890_v51 }
 0x4ad   :  { %787 = vmatpush.bf16.msrb.mxu0 %v1896_v58 }
 0x4b0   :  { %772 = vmatpush.bf16.msrb.mxu3 %v1889_v53 }
 0x4b1   :  { %788 = vmatpush.bf16.msrb.mxu0 %v1895_v60 }
 0x4b4   :  { %773 = vmatpush.bf16.msrb.mxu3 %v1888_v55 }
 0x4b5   :  { %789 = vmatpush.bf16.msrb.mxu0 %v1894_v62 }
 0x4b8   :  { %774 = vmatpush.bf16.msrb.mxu3 %v1887_v57 }
 0x4b9   :  { %790 = vmatpush.bf16.msrb.mxu0 %v1893_v63 }
 0x4bc   :  { %775 = vmatpush.bf16.msrb.mxu3 %v1886_v59 }
 0x4c0   :  { %776 = vmatpush.bf16.msrb.mxu3 %v1885_v61 }
 0x514   :  { %v352_v36 = vpop.f32.mrf.mxu1 }
 0x515   :  { %v353_v39 = vadd.f32 %v352_v36, %v316_v37 }
 0x517   :  { %v371_v50 = vmax.f32 %v353_v39, 0.0 }
 0x51a   :  { %v366_v38 = vpop.f32.mrf.mxu2 }
 0x51b   :  { %v367_v43 = vadd.f32 %v366_v38, %v317_v20  ;;  %v2004_v38 = vld [vmem:[%s2520_s12] ss:$0 sm:$0xff] }
 0x51c   :  { %v354_v40 = vpop.f32.mrf.mxu1 }
 0x51d   :  { %v355_v41 = vadd.f32 %v354_v40, %v316_v37  ;;  %v372_v47 = vmax.f32 %v367_v43, 0.0 }
 0x51f   :  { %v373_v42 = vmax.f32 %v355_v41, 0.0 }
 0x521   :  { %v375_v44 = vpack.c.bf16 %v373_v42, %v371_v50 }
 0x522   :  { %v368_v45 = vpop.f32.mrf.mxu2 }
 0x523   :  { %v369_v46 = vadd.f32 %v368_v45, %v317_v20  ;;  %583 = vmatmul.bf16.vlgmr.msra.gmra.mxu3 %v375_v44  ;;  %611 = vmatmul.bf16.vlgmr.msra.gmra.mxu1 %v375_v44 }
 0x525   :  { %v374_v48 = vmax.f32 %v369_v46, 0.0  ;;  %v2369_v46 = vmov 0.0  }
 0x527   :  { %v376_v49 = vpack.c.bf16 %v374_v48, %v372_v47 }
 0x529   :  { %597 = vmatmul.bf16.vlgmr.msra.gmra.mxu0 %v376_v49  ;;  %625 = vmatmul.bf16.vlgmr.msrb.gmra.mxu2 %v376_v49 }
 0x5a0   :  { %v612_v0 = vpop.f32.mrf.mxu1 }
 0x5a1   :  { %v613_v25 = vadd.f32 %v612_v0, %v412_v16 }
 0x5a6   :  { %v584_v11 = vpop.f32.mrf.mxu3  ;;  %v598_v12 = vpop.f32.mrf.mxu0 }
 0x5a7   :  { %v585_v14 = vadd.f32 %v584_v11, %v411_v13 }
 0x5a8   :  { %v614_v23 = vpop.f32.mrf.mxu1 }
 0x5a9   :  { %v599_v18 = vadd.f32 %v598_v12, %v585_v14  ;;  %v615_v30 = vadd.f32 %v614_v23, %v412_v16 }
 0x5ab   :  { %v631_v29 = vmax.f32 %v599_v18, 0.0 }
 0x5ac   :  { %v626_v15 = vpop.f32.mrf.mxu2 }
 0x5ad   :  { %v627_v31 = vadd.f32 %v626_v15, %v613_v25 }
 0x5ae   :  { %v586_v17 = vpop.f32.mrf.mxu3  ;;  %v600_v24 = vpop.f32.mrf.mxu0 }
 0x5af   :  { %v587_v22 = vadd.f32 %v586_v17, %v411_v13  ;;  %v632_v35 = vmax.f32 %v627_v31, 0.0 }
 0x5b1   :  { %v601_v26 = vadd.f32 %v600_v24, %v587_v22 }
 0x5b3   :  { %v633_v32 = vmax.f32 %v601_v26, 0.0 }
 0x5b4   :  { %v628_v33 = vpop.f32.mrf.mxu2 }
 0x5b5   :  { %v635_v21 = vpack.c.bf16 %v633_v32, %v631_v29  ;;  %v629_v34 = vadd.f32 %v628_v33, %v615_v30 }
 0x5b7   :  { %v634_v36 = vmax.f32 %v629_v34, 0.0  ;;  %777 = vmatmul.bf16.vlgmr.msrb.gmra.mxu3 %v635_v21 }
 0x5b9   :  { %v636_v37 = vpack.c.bf16 %v634_v36, %v632_v35 }
 0x5bb   :  { %791 = vmatmul.bf16.vlgmr.msrb.gmra.mxu0 %v636_v37 }
 0x638   :  { %v792_v39 = vpop.f32.mrf.mxu0 }
 0x63a   :  { %v778_v40 = vpop.f32.mrf.mxu3 }
 0x63b   :  { %v779_v20 = vadd.f32 %v2004_v38, %v778_v40 }
 0x63d   :  { %v793_v41 = vadd.f32 %v792_v39, %v779_v20 }
 0x63f   :  { %797 = vst.msk [vmem:[%s2521_s13] sm:$0xff] %vm87_vm0, %v793_v41 }
 0x640   :  { %v794_v43 = vpop.f32.mrf.mxu0 }
 0x642   :  { %v780_v50 = vpop.f32.mrf.mxu3 }
 0x643   :  { %v781_v42 = vadd.f32 %v2004_v38, %v780_v50  ;;  %1373 = sbr.rel (%p1617_p0) target bundleno = 2291 (0x8f3), region = 85 }
 0x645   :  { %v795_v44 = vadd.f32 %v794_v43, %v781_v42 }
 0x647   :  { %798 = vst.msk [vmem:[%s2521_s13 + $0x8] sm:$0xff] %vm87_vm0, %v795_v44  ;;  %v811_v45 = vrot.slane %v795_v44, 6  }
 0x648   :  { %v2371_v47 = vmov 0.0  }
 0x649 LB: > { %v1633_v27 = vor.u32 %v2221_v10, %v2216_v9  ;;  %s2095_s13 = smov 32   ;;  %v1629_v48 = vor.u32 %v2211_v8, %v2206_v7  ;;  %v1625_v49 = vor.u32 %v2198_v5, %v2193_v4  ;;  %v1621_v51 = vor.u32 %v2186_v2, %v2181_v1  ;;  %v1908_v55 = vld [vmem:[%s2515_s7 + $0x14] sm:$0xf0]  ;;  %v1637_v57 = vld [vmem:[%s2515_s7] sm:$0xf]  ;;  %s2085_s9 = sphi %s2379_s9, %s819_s9   ;;  %v2081_v45 = vphi %v811_v45, %v1346_v45   ;;  %v2077_v28 = vphi %v814_v28, %v2423_v28   ;;  %v2073_v47 = vphi %v2371_v47, %v2523_v47  }
 0x64a   : > { %826 = vrot.lane.b32.xlu0 %v2077_v28, %s2095_s13  ;;  %vm855_vm4 = vcmask 523264   ;;  %v1645_v28 = vld [vmem:[%s2515_s7 + $0x10] sm:$0xf]  ;;  %v1906_v58 = vld [vmem:[%s2515_s7 + $0x4] sm:$0xf0] }
 0x64b   : > { %863 = vmatpush.bf16.msra.mxu0 %v1633_v27  ;;  %v1646_v56 = vor.u32 %v1908_v55, %v1645_v28  ;;  %v1638_v59 = vor.u32 %v1906_v58, %v1637_v57  ;;  %v1907_v60 = vld [vmem:[%s2515_s7 + $0x14] sm:$0xf]  ;;  %v1647_v61 = vld [vmem:[%s2515_s7 + $0x18] sm:$0xf0]  ;;  %v1905_v62 = vld [vmem:[%s2515_s7 + $0x4] sm:$0xf] }
 0x64c   : > { %v1650_v63 = vor.u32 %v1907_v60, %v1647_v61  ;;  %v1639_v0 = vld [vmem:[%s2515_s7 + $0x8] sm:$0xf0]  ;;  %v1711_v11 = vld [vmem:[#allocation3 + $0x70] sm:$0xf]  ;;  %v1924_v12 = vld [vmem:[#allocation3 + $0x74] sm:$0xf0] }
 0x64d   : > { %913 = vmatpush.bf16.msra.mxu2 %v1646_v56  ;;  %v1642_v6 = vor.u32 %v1905_v62, %v1639_v0  ;;  %v1712_v13 = vor.u32 %v1924_v12, %v1711_v11  ;;  %v1703_v14 = vld [vmem:[#allocation3 + $0x60] sm:$0xf]  ;;  %v1922_v15 = vld [vmem:[#allocation3 + $0x64] sm:$0xf0]  ;;  %v1695_v18 = vld [vmem:[#allocation3 + $0x50] sm:$0xf] }
 0x64e   : > { %v1704_v16 = vor.u32 %v1922_v15, %v1703_v14  ;;  %v1920_v22 = vld [vmem:[#allocation3 + $0x54] sm:$0xf0]  ;;  %v1775_v24 = vld [vmem:[#allocation3 + $0xf0] sm:$0xf]  ;;  %v1939_v30 = vld [vmem:[#allocation3 + $0xf4] sm:$0xf] }
 0x64f   : > { %864 = vmatpush.bf16.msra.mxu0 %v1629_v48  ;;  %1135 = vmatpush.bf16.msra.mxu3 %v1712_v13  ;;  %v1940_v25 = vld [vmem:[#allocation3 + $0xf4] sm:$0xf0]  ;;  %v1696_v26 = vor.u32 %v1920_v22, %v1695_v18  ;;  %v1777_v31 = vld [vmem:[#allocation3 + $0xf8] sm:$0xf0]  ;;  %v1687_v32 = vld [vmem:[#allocation3 + $0x40] sm:$0xf] }
 0x650   : > { %v1776_v29 = vor.u32 %v1940_v25, %v1775_v24  ;;  %v1918_v33 = vld [vmem:[#allocation3 + $0x44] sm:$0xf0]  ;;  %v1780_v21 = vor.u32 %v1939_v30, %v1777_v31  ;;  %v1767_v34 = vld [vmem:[#allocation3 + $0xe0] sm:$0xf]  ;;  %v1923_v35 = vld [vmem:[#allocation3 + $0x74] sm:$0xf] }
 0x651   : > { %914 = vmatpush.bf16.msra.mxu2 %v1638_v59  ;;  %v1938_v36 = vld [vmem:[#allocation3 + $0xe4] sm:$0xf0]  ;;  %v1713_v37 = vld [vmem:[#allocation3 + $0x78] sm:$0xf0]  ;;  %v1937_v39 = vld [vmem:[#allocation3 + $0xe4] sm:$0xf]  ;;  %v1688_v20 = vor.u32 %v1918_v33, %v1687_v32 }
 0x652   : > { %1148 = vmatpush.bf16.msra.mxu1 %v1776_v29  ;;  %v1768_v38 = vor.u32 %v1938_v36, %v1767_v34  ;;  %v1769_v40 = vld [vmem:[#allocation3 + $0xe8] sm:$0xf0]  ;;  %v1679_v42 = vld [vmem:[#allocation3 + $0x30] sm:$0xf]  ;;  %v1916_v43 = vld [vmem:[#allocation3 + $0x34] sm:$0xf0]  ;;  %v1716_v44 = vor.u32 %v1923_v35, %v1713_v37 }
 0x653   : > { %865 = vmatpush.bf16.msra.mxu0 %v1625_v49  ;;  %1136 = vmatpush.bf16.msra.mxu3 %v1704_v16  ;;  %v1772_v41 = vor.u32 %v1937_v39, %v1769_v40  ;;  %v1921_v46 = vld [vmem:[#allocation3 + $0x64] sm:$0xf]  ;;  %v1705_v27 = vld [vmem:[#allocation3 + $0x68] sm:$0xf0]  ;;  %v1680_v48 = vor.u32 %v1916_v43, %v1679_v42  ;;  %v1671_v49 = vld [vmem:[#allocation3 + $0x20] sm:$0xf] }
 0x654   : > { %v1917_v57 = vld [vmem:[#allocation3 + $0x44] sm:$0xf]  ;;  %v1689_v58 = vld [vmem:[#allocation3 + $0x48] sm:$0xf0]  ;;  %v1915_v60 = vld [vmem:[#allocation3 + $0x34] sm:$0xf] }
 0x655   : > { %926 = vmatpush.bf16.msrb.mxu2 %v1650_v63  ;;  %v1692_v59 = vor.u32 %v1917_v57, %v1689_v58  ;;  %v1681_v61 = vld [vmem:[#allocation3 + $0x38] sm:$0xf0]  ;;  %v1913_v63 = vld [vmem:[#allocation3 + $0x24] sm:$0xf]  ;;  %v1673_v0 = vld [vmem:[#allocation3 + $0x28] sm:$0xf0] }
 0x656   : > { %1149 = vmatpush.bf16.msra.mxu1 %v1768_v38  ;;  %v1684_v62 = vor.u32 %v1915_v60, %v1681_v61  ;;  %v1663_v11 = vld [vmem:[#allocation3 + $0x10] sm:$0xf]  ;;  %v1912_v12 = vld [vmem:[#allocation3 + $0x14] sm:$0xf0]  ;;  %v1911_v16 = vld [vmem:[#allocation3 + $0x14] sm:$0xf] }
 0x657   : > { %866 = vmatpush.bf16.msra.mxu0 %v1621_v51  ;;  %1137 = vmatpush.bf16.msra.mxu3 %v1696_v26  ;;  %v1914_v51 = vld [vmem:[#allocation3 + $0x24] sm:$0xf0]  ;;  %v1759_v13 = vld [vmem:[#allocation3 + $0xd0] sm:$0xf]  ;;  %v1664_v14 = vor.u32 %v1912_v12, %v1663_v11  ;;  %v1936_v15 = vld [vmem:[#allocation3 + $0xd4] sm:$0xf0] }
 0x658   : > { %v1672_v55 = vor.u32 %v1914_v51, %v1671_v49  ;;  %v1760_v18 = vor.u32 %v1936_v15, %v1759_v13  ;;  %v1761_v24 = vld [vmem:[#allocation3 + $0xd8] sm:$0xf0]  ;;  %v1655_v26 = vld [vmem:[#allocation3] sm:$0xf]  ;;  %v1910_v29 = vld [vmem:[#allocation3 + $0x4] sm:$0xf0] }
 0x659   : > { %927 = vmatpush.bf16.msrb.mxu2 %v1642_v6  ;;  %v1676_v6 = vor.u32 %v1913_v63, %v1673_v0  ;;  %v1751_v30 = vld [vmem:[#allocation3 + $0xc0] sm:$0xf]  ;;  %v1656_v31 = vor.u32 %v1910_v29, %v1655_v26  ;;  %v1934_v32 = vld [vmem:[#allocation3 + $0xc4] sm:$0xf0]  ;;  %v1909_v33 = vld [vmem:[#allocation3 + $0x4] sm:$0xf] }
 0x65a   : > { %1150 = vmatpush.bf16.msra.mxu1 %v1760_v18  ;;  %v1752_v34 = vor.u32 %v1934_v32, %v1751_v30  ;;  %v1933_v36 = vld [vmem:[#allocation3 + $0xc4] sm:$0xf]  ;;  %v1753_v37 = vld [vmem:[#allocation3 + $0xc8] sm:$0xf0]  ;;  %v1743_v39 = vld [vmem:[#allocation3 + $0xb0] sm:$0xf] }
 0x65b   : > { %1174 = vmatpush.bf16.msrb.mxu0 %v1780_v21  ;;  %1138 = vmatpush.bf16.msra.mxu3 %v1688_v20  ;;  %v1657_v21 = vld [vmem:[#allocation3 + $0x8] sm:$0xf0]  ;;  %v1756_v38 = vor.u32 %v1933_v36, %v1753_v37  ;;  %v1932_v40 = vld [vmem:[#allocation3 + $0xb4] sm:$0xf0]  ;;  %v1931_v20 = vld [vmem:[#allocation3 + $0xb4] sm:$0xf] }
 0x65c   : > { %v1660_v35 = vor.u32 %v1909_v33, %v1657_v21  ;;  %v1735_v43 = vld [vmem:[#allocation3 + $0xa0] sm:$0xf]  ;;  %v1727_v49 = vld [vmem:[#allocation3 + $0x90] sm:$0xf]  ;;  %v1928_v51 = vld [vmem:[#allocation3 + $0x94] sm:$0xf0] }
 0x65d   : > { %v1926_v57 = vld [vmem:[#allocation3 + $0x84] sm:$0xf0]  ;;  %v1925_v58 = vld [vmem:[#allocation3 + $0x84] sm:$0xf]  ;;  %v1721_v60 = vld [vmem:[#allocation3 + $0x88] sm:$0xf0] }
 0x65e   : > { %1151 = vmatpush.bf16.msra.mxu1 %v1752_v34  ;;  %v1724_v61 = vor.u32 %v1925_v58, %v1721_v60  ;;  %v1956_v63 = vld [vmem:[%s2519_s11 + $0x78] sm:$0xff]  ;;  %v878_v0 = vld [vmem:[%s2516_s8] sm:$0x3]  ;;  %v1955_v11 = vld [vmem:[%s2519_s11 + $0x70] sm:$0xff] }
 0x65f   : > { %1175 = vmatpush.bf16.msrb.mxu0 %v1772_v41  ;;  %1139 = vmatpush.bf16.msra.mxu3 %v1680_v48  ;;  %v1744_v41 = vor.u32 %v1932_v40, %v1743_v39  ;;  %v880_v12 = vperm.slane %v878_v0, 0  ;;  %v1946_v13 = vld [vmem:[%s2519_s11 + $0x28] sm:$0xff]  ;;  %v1953_v18 = vld [vmem:[%s2519_s11 + $0x60] sm:$0xff]  ;;  %v1944_v33 = vld [vmem:[%s2519_s11 + $0x18] sm:$0xff]  ;;  %v1349_v40 = vstv %s2085_s9  ;;  %s819_s9 = sadd.s32 1, %s2085_s9  }
 0x660   : > { %v1952_v21 = vld [vmem:[%s2519_s11 + $0x58] sm:$0xff]  ;;  %v1943_v34 = vld [vmem:[%s2519_s11 + $0x10] sm:$0xff]  ;;  %v1942_v36 = vld [vmem:[%s2519_s11 + $0x8] sm:$0xff]  ;;  %vm1350_vm5 = vcmp.eq.s32.totalorder %v2188_v3, %v1349_v40  ;;  %p818_p1 = scmp.ge.s32.totalorder %s819_s9, %s2509_s1 }
 0x661   : > { %v1950_v37 = vld [vmem:[%s2519_s11 + $0x48] sm:$0xff]  ;;  %v1949_v39 = vld [vmem:[%s2519_s11 + $0x40] sm:$0xff] }
 0x662   : > { %1152 = vmatpush.bf16.msra.mxu1 %v1744_v41 }
 0x663   : > { %1140 = vmatpush.bf16.msra.mxu3 %v1672_v55 }
 0x667   : > { %1141 = vmatpush.bf16.msra.mxu3 %v1664_v14  ;;  %v1954_v14 = vld [vmem:[%s2519_s11 + $0x68] sm:$0xff] }
 0x66b   : > { %1142 = vmatpush.bf16.msra.mxu3 %v1656_v31 }
 0x6bc   : > { %v827_v52 = vpop.permute.xlu0 %826 }
 0x6bd   : > { %v829_v53 = vsel %vm87_vm0, %v2081_v45, %v827_v52  ;;  %v1708_v52 = vor.u32 %v1921_v46, %v1705_v27  ;;  %v1737_v27 = vld [vmem:[#allocation3 + $0xa8] sm:$0xf0] }
 0x6be   : > { %v830_v54 = vpack.c.bf16 %v829_v53, %v829_v53  ;;  %v1919_v53 = vld [vmem:[#allocation3 + $0x54] sm:$0xf] }
 0x6c0   : > { %1634 = vmatmul.msk.bf16.vlgmr.msra.gmra.mxu0 %vm855_vm4, %v830_v54  ;;  %v1697_v54 = vld [vmem:[#allocation3 + $0x58] sm:$0xf0] }
 0x6c1   : > { %v1700_v56 = vor.u32 %v1919_v53, %v1697_v54  ;;  %v1728_v53 = vor.u32 %v1928_v51, %v1727_v49  ;;  %v1729_v54 = vld [vmem:[#allocation3 + $0x98] sm:$0xf0] }
 0x73d   : > { %v868_v17 = vpop.f32.mrf.mxu0 }
 0x73e   : > { %v869_v23 = vadd.f32 %v2242_v19, %v868_v17  ;;  %v1665_v17 = vld [vmem:[#allocation3 + $0x18] sm:$0xf0] }
 0x73f   : > { %v1668_v22 = vor.u32 %v1911_v16, %v1665_v17  ;;  %v1945_v17 = vld [vmem:[%s2519_s11 + $0x20] sm:$0xff] }
 0x740   : > { %2023 = vtanh.f32 %v869_v23  ;;  %v1935_v23 = vld [vmem:[#allocation3 + $0xd4] sm:$0xf] }
 0x741   : > { %v1764_v25 = vor.u32 %v1935_v23, %v1761_v24 }
 0x743   : > { %1176 = vmatpush.bf16.msrb.mxu0 %v1764_v25  ;;  %v881_v25 = vperm.slane %v878_v0, 1 }
 0x745   : > { %v870_v50 = vpop.f32.mrf.mxu0 }
 0x746   : > { %v2423_v28 = vpop.eup %2023   ;;  %v1745_v50 = vld [vmem:[#allocation3 + $0xb8] sm:$0xf0] }
 0x747   : > { %v873_v45 = vpack.c.bf16 %v2423_v28, %v2423_v28  ;;  %1177 = vmatpush.bf16.msrb.mxu0 %v1756_v38  ;;  %v1748_v42 = vor.u32 %v1931_v20, %v1745_v50  ;;  %v1941_v38 = vld [vmem:[%s2519_s11] sm:$0xff]  ;;  %v2096_v20 = vmov 0  }
 0x748   : > { %2021 = vset.pattern.permute.xlu0 %v2096_v20  ;;  %v1351_v41 = vsel %vm1350_vm5, 1, %v2096_v20 }
 0x749   : > { %1651 = vmatmul.msk.bf16.vlgmr.msra.gmra.mxu2 %vm87_vm0, %v873_v45  ;;  %1353 = vperm.xlu0 %2021, %v1351_v41  }
 0x74a   : > { %1161 = vmatpush.bf16.msra.mxu2 %v1716_v44  ;;  %v1930_v44 = vld [vmem:[#allocation3 + $0xa4] sm:$0xf0] }
 0x74b   : > { %v1736_v46 = vor.u32 %v1930_v44, %v1735_v43  ;;  %1178 = vmatpush.bf16.msrb.mxu0 %v1748_v42  ;;  %v969_v43 = vld [vmem:[%s2518_s10] sm:$0x3] }
 0x74c   : > { %v971_v44 = vperm.slane %v969_v43, 0 }
 0x74d   : > { %1153 = vmatpush.bf16.msra.mxu1 %v1736_v46 }
 0x74e   : > { %1162 = vmatpush.bf16.msra.mxu2 %v1708_v52  ;;  %v1927_v52 = vld [vmem:[#allocation3 + $0x94] sm:$0xf] }
 0x74f   : > { %v1732_v55 = vor.u32 %v1927_v52, %v1729_v54 }
 0x751   : > { %1154 = vmatpush.bf16.msra.mxu1 %v1728_v53 }
 0x752   : > { %1163 = vmatpush.bf16.msra.mxu2 %v1700_v56  ;;  %v1719_v56 = vld [vmem:[#allocation3 + $0x80] sm:$0xf] }
 0x756   : > { %1164 = vmatpush.bf16.msra.mxu2 %v1692_v59  ;;  %v1720_v59 = vor.u32 %v1926_v57, %v1719_v56 }
 0x758   : > { %1155 = vmatpush.bf16.msra.mxu1 %v1720_v59 }
 0x759   : > { %1652 = vmatmul.msk.bf16.vlgmr.msrb.gmra.mxu2 %vm87_vm0, %v873_v45  ;;  %v1929_v45 = vld [vmem:[#allocation3 + $0xa4] sm:$0xf] }
 0x75a   : > { %1165 = vmatpush.bf16.msra.mxu2 %v1684_v62  ;;  %v1740_v48 = vor.u32 %v1929_v45, %v1737_v27  ;;  %v1948_v62 = vld [vmem:[%s2519_s11 + $0x38] sm:$0xff]  ;;  %v972_v45 = vperm.slane %v969_v43, 1 }
 0x75b   : > { %1323 = vmatpush.bf16.msrb.mxu3 %v1948_v62  ;;  %v2022_v62 = vld [vmem:[%s2520_s12] ss:$0 sm:$0xff] }
 0x75c   : > { %1179 = vmatpush.bf16.msrb.mxu0 %v1740_v48  ;;  %1336 = vmatpush.bf16.msrb.mxu1 %v1956_v63 }
 0x75e   : > { %1166 = vmatpush.bf16.msra.mxu2 %v1676_v6  ;;  %v1947_v6 = vld [vmem:[%s2519_s11 + $0x30] sm:$0xff] }
 0x75f   : > { %1324 = vmatpush.bf16.msrb.mxu3 %v1947_v6 }
 0x760   : > { %1180 = vmatpush.bf16.msrb.mxu0 %v1732_v55  ;;  %1337 = vmatpush.bf16.msrb.mxu1 %v1955_v11 }
 0x762   : > { %1167 = vmatpush.bf16.msra.mxu2 %v1668_v22 }
 0x763   : > { %1325 = vmatpush.bf16.msrb.mxu3 %v1946_v13 }
 0x764   : > { %1181 = vmatpush.bf16.msrb.mxu0 %v1724_v61  ;;  %1338 = vmatpush.bf16.msrb.mxu1 %v1954_v14 }
 0x766   : > { %1168 = vmatpush.bf16.msra.mxu2 %v1660_v35  ;;  %v1951_v35 = vld [vmem:[%s2519_s11 + $0x50] sm:$0xff] }
 0x767   : > { %1326 = vmatpush.bf16.msrb.mxu3 %v1945_v17 }
 0x768   : > { %1339 = vmatpush.bf16.msrb.mxu1 %v1953_v18 }
 0x76b   : > { %1327 = vmatpush.bf16.msrb.mxu3 %v1944_v33 }
 0x76c   : > { %1340 = vmatpush.bf16.msrb.mxu1 %v1952_v21 }
 0x76f   : > { %1328 = vmatpush.bf16.msrb.mxu3 %v1943_v34 }
 0x770   : > { %1341 = vmatpush.bf16.msrb.mxu1 %v1951_v35 }
 0x773   : > { %1329 = vmatpush.bf16.msrb.mxu3 %v1942_v36 }
 0x774   : > { %1342 = vmatpush.bf16.msrb.mxu1 %v1950_v37 }
 0x777   : > { %1330 = vmatpush.bf16.msrb.mxu3 %v1941_v38 }
 0x778   : > { %1343 = vmatpush.bf16.msrb.mxu1 %v1949_v39 }
 0x7bb   : > { %v1354_v63 = vpop.permute.xlu0 %1353 }
 0x7bc   : > { %vm1355_vm6 = vcmp.eq.s32.totalorder %v1354_v63, 1 }
 0x7cc   : > { %v916_v15 = vpop.f32.mrf.mxu2 }
 0x7cd   : > { %v917_v16 = vadd.f32 %v916_v15, %v880_v12 }
 0x7cf   : > { %v933_v22 = vmax.f32 %v917_v16, 0.0 }
 0x7d1   : > { %v935_v23 = vpack.c.bf16 %v933_v22, %v933_v22 }
 0x7d3   : > { %1143 = vmatmul.bf16.vlgmr.msra.gmra.mxu3 %v935_v23  ;;  %1169 = vmatmul.bf16.vlgmr.msra.gmra.mxu2 %v935_v23 }
 0x7d4   : > { %v918_v24 = vpop.f32.mrf.mxu2 }
 0x7dc   : > { %v929_v26 = vpop.f32.mrf.mxu2 }
 0x7dd   : > { %v930_v29 = vadd.f32 %v929_v26, %v881_v25 }
 0x7df   : > { %v934_v30 = vmax.f32 %v930_v29, 0.0 }
 0x7e1   : > { %v936_v31 = vpack.c.bf16 %v934_v30, %v934_v30 }
 0x7e3   : > { %1156 = vmatmul.bf16.vlgmr.msra.gmra.mxu1 %v936_v31  ;;  %1182 = vmatmul.bf16.vlgmr.msrb.gmra.mxu0 %v936_v31 }
 0x7e4   : > { %v931_v32 = vpop.f32.mrf.mxu2 }
 0x856   : > { %v1144_v50 = vpop.f32.mrf.mxu3  ;;  %v1170_v42 = vpop.f32.mrf.mxu2 }
 0x857   : > { %v1145_v48 = vadd.f32 %v1144_v50, %v971_v44  ;;  %v1171_v49 = vadd.f32 %v1170_v42, %v972_v45 }
 0x85e   : > { %v1146_v46 = vpop.f32.mrf.mxu3  ;;  %v1172_v27 = vpop.f32.mrf.mxu2 }
 0x860   : > { %v1157_v51 = vpop.f32.mrf.mxu1  ;;  %v1183_v52 = vpop.f32.mrf.mxu0 }
 0x861   : > { %v1158_v53 = vadd.f32 %v1157_v51, %v1145_v48  ;;  %v1184_v54 = vadd.f32 %v1183_v52, %v1171_v49 }
 0x863   : > { %v1187_v55 = vmax.f32 %v1158_v53, 0.0  ;;  %v1188_v56 = vmax.f32 %v1184_v54, 0.0 }
 0x865   : > { %v1189_v57 = vpack.c.bf16 %v1187_v55, %v1187_v55  ;;  %v1190_v58 = vpack.c.bf16 %v1188_v56, %v1188_v56 }
 0x867   : > { %1331 = vmatmul.bf16.vlgmr.msrb.gmra.mxu3 %v1189_v57  ;;  %1344 = vmatmul.bf16.vlgmr.msrb.gmra.mxu1 %v1190_v58 }
 0x868   : > { %v1159_v59 = vpop.f32.mrf.mxu1  ;;  %v1185_v60 = vpop.f32.mrf.mxu0 }
 0x8e4   : > { %v1345_v61 = vpop.f32.mrf.mxu1 }
 0x8ea   : > { %v1332_v0 = vpop.f32.mrf.mxu3 }
 0x8eb   : > { %v1333_v6 = vadd.f32 %v2022_v62, %v1332_v0 }
 0x8ec   : > { %v1347_v11 = vpop.f32.mrf.mxu1 }
 0x8ed   : > { %v1346_v45 = vadd.f32 %v1345_v61, %v1333_v6  }
 0x8ee   :  { %821 = sbr.rel (!%p818_p1) target bundleno = 1609 (0x649), region = 91 }
 0x8ef   : > { %v1356_v12 = vsel %vm1355_vm6, %v1346_v45, %v2073_v47  }
 0x8f0   : > { %v2523_v47 = vmov %v1356_v12  ;;  %v2524_v46 = vmov (%p818_p1), %v1356_v12 }
 0x8f2   : > { %v1334_v13 = vpop.f32.mrf.mxu3 }
 0x8f3 PF:  { %vm1357_vm7 = vcmask 254976   ;;  %v2089_v46 = vphi %v2369_v46, %v2524_v46  }
 0x8f4   :  { %1358 = vst.msk [vmem:[%s2522_s14] sm:$0x3] %vm1357_vm7, %v2089_v46 }
 0x8f5   :  { %1367 = vsyncpa [#allocation4], 1 }

</bundles_post_ra>
